<compile_context>
chip_gen: v5e
topology: v5e:2x2
jax: 0.10.0
libtpu: 0.0.40
codegen_flags: <defaults>
</compile_context>

<pallas_src>
import jax
import jax.numpy as jnp
from jax.experimental import pallas as pl
from jax.experimental.pallas import tpu as pltpu


def _round_up(a, b):
    return (a + b - 1) // b * b


# ---------------------------------------------------------------------------
# pltpu.roll shift-convention probe (run once, eagerly, before any tracing).
# True  -> pltpu.roll(x, s)[i] == x[(i - s) % L]  (numpy/jnp.roll convention)
# False -> pltpu.roll(x, s)[i] == x[(i + s) % L]
# Either way the conv kernels below are built with the correct shift.
# ---------------------------------------------------------------------------
_ROLL_LIKE_NP_ROLL = True


def _detect_roll_convention():
    def kern(x_ref, o_ref):
        o_ref[...] = pltpu.roll(x_ref[...], shift=1, axis=1)

    x = jnp.tile(jnp.arange(128, dtype=jnp.float32)[None, :], (8, 1))
    out = pl.pallas_call(
        kern, out_shape=jax.ShapeDtypeStruct((8, 128), jnp.float32))(x)
    return bool(jax.device_get(out)[0, 0] == 127.0)


# ---------------------------------------------------------------------------
# Fused  3x3 valid conv + bias + ReLU + MaxPool(2, stride 1)   (one layer)
#
# x    : (N, Cin, L)   channel-major, flat spatial with row stride `width`;
#                      L >= h_in*width (tail / columns beyond the valid width
#                      are don't-care).
# taps : (9, Cout, Cin)  weight tap t = kh*3 + kw.
# bias : (Cout, 1)
# out  : (N, Cout, L_out) same flat layout, h_out = h_in - 3 (conv -2, pool -1)
# ---------------------------------------------------------------------------
def _conv_relu_pool_call(x, taps, bias, *, width, h_in, roll_like_np):
    n, cin, l_in = x.shape
    cout = int(taps.shape[1])
    assert int(taps.shape[2]) == cin
    assert l_in >= h_in * width
    l_out = _round_up((h_in - 3) * width, 128)
    assert l_out <= l_in

    def shift_left(a, off):
        # a_shifted[:, q] = a[:, (q + off) mod L]
        if off == 0:
            return a
        l = a.shape[1]
        s = (l - off) % l if roll_like_np else off % l
        return pltpu.roll(a, shift=s, axis=1)

    def kernel(x_ref, w_ref, b_ref, o_ref):
        xv = x_ref[0]                                        # (Cin, L)
        acc = jnp.zeros((cout, l_in), jnp.float32)
        # in-kernel im2col: 9 shifted accumulating matmuls on the MXU,
        # spatial positions stay on the lane axis (lane-dense).
        for kh in range(3):
            for kw in range(3):
                t = kh * 3 + kw
                xs = shift_left(xv, kh * width + kw)         # (Cin, L)
                acc = acc + jnp.dot(w_ref[t], xs,
                                    preferred_element_type=jnp.float32)
        acc = jnp.maximum(acc + b_ref[...], 0.0)             # bias + ReLU
        # MaxPool2d(2, stride 1) on the stride-`width` flat layout.
        pooled = jnp.maximum(acc, shift_left(acc, 1))
        pooled = jnp.maximum(pooled, shift_left(acc, width))
        pooled = jnp.maximum(pooled, shift_left(acc, width + 1))
        o_ref[0] = pooled[:, :l_out]                         # aligned, lane-dense

    return pl.pallas_call(
        kernel,
        out_shape=jax.ShapeDtypeStruct((n, cout, l_out), jnp.float32),
        grid=(n,),
        in_specs=[
            pl.BlockSpec((1, cin, l_in), lambda i: (i, 0, 0)),
            pl.BlockSpec((9, cout, cin), lambda i: (0, 0, 0)),
            pl.BlockSpec((cout, 1), lambda i: (0, 0)),
        ],
        out_specs=pl.BlockSpec((1, cout, l_out), lambda i: (i, 0, 0)),
        compiler_params=pltpu.CompilerParams(
            dimension_semantics=("parallel",),
            vmem_limit_bytes=32 * 1024 * 1024),
    )(x, taps, bias)


# ---------------------------------------------------------------------------
# Final Linear(161024 -> 256).  Weight is already (K, M); K-tiled accumulation
# ("arbitrary", last axis), M split into 128-wide tiles ("parallel" -> both
# v7x TensorCores).  tk=4736 keeps the double-buffered weight tile ~4.9 MB,
# safe under v5e's 16 MiB scoped VMEM.
# ---------------------------------------------------------------------------
def _linear_call(x, w_km, b_1m, *, tk=4736, tm=128):
    n, k_dim = x.shape
    m_dim = int(w_km.shape[1])
    assert k_dim == int(w_km.shape[0])
    assert k_dim % tk == 0 and m_dim % tm == 0

    def kernel(x_ref, w_ref, b_ref, o_ref):
        @pl.when(pl.program_id(1) == 0)
        def _():
            o_ref[...] = jnp.broadcast_to(b_ref[...], o_ref.shape)

        o_ref[...] += jnp.dot(x_ref[...], w_ref[...],
                              preferred_element_type=jnp.float32)

    return pl.pallas_call(
        kernel,
        out_shape=jax.ShapeDtypeStruct((n, m_dim), jnp.float32),
        grid=(m_dim // tm, k_dim // tk),
        in_specs=[
            pl.BlockSpec((n, tk), lambda j, k: (0, k)),
            pl.BlockSpec((tk, tm), lambda j, k: (k, j)),
            pl.BlockSpec((1, tm), lambda j, k: (0, j)),
        ],
        out_specs=pl.BlockSpec((n, tm), lambda j, k: (0, j)),
        compiler_params=pltpu.CompilerParams(
            dimension_semantics=("parallel", "arbitrary")),
        cost_estimate=pl.CostEstimate(
            flops=2 * n * k_dim * m_dim,
            transcendentals=0,
            bytes_accessed=4 * (k_dim * m_dim + 2 * n * k_dim + n * m_dim)),
    )(x, w_km, b_1m)


# ---------------------------------------------------------------------------
# One-time (outside jit) repacking of the torch parameters.
#  - conv weights (Cout,Cin,3,3) -> (9, Cout, Cin) taps; conv1 Cin padded 2->8.
#  - fc weight (256, 161024) -> (161024, 256): no per-call transpose, and the
#    conv stack already produces NCHW-flatten order so no column permutation.
# TODO(synk): storing wfc in bf16 would halve the dominant HBM stream but
# changes numerics, so it is left in f32 here.
# ---------------------------------------------------------------------------
def prepare_params(w1, b1, w2, b2, w3, b3, wfc, bfc):
    def taps(w, pad_cin_to=None):
        cout, cin = int(w.shape[0]), int(w.shape[1])
        t = jnp.transpose(w, (2, 3, 0, 1)).reshape(9, cout, cin)
        if pad_cin_to is not None and pad_cin_to > cin:
            t = jnp.pad(t, ((0, 0), (0, 0), (0, pad_cin_to - cin)))
        return t

    return (taps(w1, pad_cin_to=8), b1.reshape(-1, 1),
            taps(w2), b2.reshape(-1, 1),
            taps(w3), b3.reshape(-1, 1),
            jnp.transpose(wfc), bfc.reshape(1, -1))


# ---------------------------------------------------------------------------
# Full forward pass (mirrors FeatureExtractor_azimuth.forward).
# NOTE: self.dropout1 is defined in __init__ but never used in forward.
# ---------------------------------------------------------------------------
@jax.jit
def feature_extractor_azimuth(x_nchw, t1, b1c, t2, b2c, t3, b3c, wfc_km, bfc_1m):
    n, cin, h, w = x_nchw.shape
    roll_np = _ROLL_LIKE_NP_ROLL

    l0 = _round_up(h * w, 128)
    x = x_nchw.reshape(n, cin, h * w)
    x = jnp.pad(x, ((0, 0), (0, 8 - cin), (0, l0 - h * w)))   # Cin 2->8, align L

    x = _conv_relu_pool_call(x, t1, b1c, width=w, h_in=h,
                             roll_like_np=roll_np)            # (N, 8, ~74*83)
    x = _conv_relu_pool_call(x, t2, b2c, width=w, h_in=h - 3,
                             roll_like_np=roll_np)            # (N,16, ~71*83)
    x = _conv_relu_pool_call(x, t3, b3c, width=w, h_in=h - 6,
                             roll_like_np=roll_np)            # (N,32, ~68*83)

    hf, wf = h - 9, w - 9                                     # 68, 74
    assert 32 * hf * wf == int(wfc_km.shape[0])
    # Drop the alignment tail and the invalid stride columns; this is already
    # NCHW flatten order, matching torch's x.view(-1, 161024) exactly.
    feat = x[:, :, :hf * w].reshape(n, 32, hf, w)[:, :, :, :wf]
    feat = feat.reshape(n, 32 * hf * wf)
    return _linear_call(feat, wfc_km, bfc_1m)                 # (N, 256)


if __name__ == "__main__":
    # Resolve pltpu.roll's shift convention once, eagerly, before any tracing.
    _ROLL_LIKE_NP_ROLL = _detect_roll_convention()

    key = jax.random.PRNGKey(0)
    ks = jax.random.split(key, 9)

    # Linear(161024, 256) hard-codes 32*68*74 features => input spatial 77x83.
    n, h, w = 2, 77, 83
    x = jax.random.normal(ks[0], (n, 2, h, w), jnp.float32)

    # Deterministic synthetic parameters (same shapes as the nn.Module params).
    w1 = jax.random.normal(ks[1], (8, 2, 3, 3), jnp.float32) * 0.10
    b1 = jax.random.normal(ks[2], (8,), jnp.float32) * 0.10
    w2 = jax.random.normal(ks[3], (16, 8, 3, 3), jnp.float32) * 0.05
    b2 = jax.random.normal(ks[4], (16,), jnp.float32) * 0.05
    w3 = jax.random.normal(ks[5], (32, 16, 3, 3), jnp.float32) * 0.05
    b3 = jax.random.normal(ks[6], (32,), jnp.float32) * 0.05
    wfc = jax.random.normal(ks[7], (256, 161024), jnp.float32) * 0.003
    bfc = jax.random.normal(ks[8], (256,), jnp.float32) * 0.01

    params = prepare_params(w1, b1, w2, b2, w3, b3, wfc, bfc)
    out = feature_extractor_azimuth(x, *params)
    out = jax.block_until_ready(out)
    assert out.shape == (n, 256) and out.dtype == jnp.float32
    print("KERNEL_OK")
</pallas_src>

<mosaic_0001>
module attributes {stable_mosaic.version = 11 : i64} {
  func.func @kern(%arg0: memref<8x128xf32, #tpu.memory_space<vmem>>, %arg1: memref<8x128xf32, #tpu.memory_space<vmem>>) attributes {dimension_semantics = [], scalar_prefetch = 0 : i64, scratch_operands = 0 : i64, tpu.core_type = #tpu.core_type<tc>} {
    %c0 = arith.constant 0 : index
    %c0_0 = arith.constant 0 : index
    %0 = vector.load %arg0[%c0, %c0_0] : memref<8x128xf32, #tpu.memory_space<vmem>>, vector<8x128xf32>
    %c1_i32 = arith.constant 1 : i32
    %1 = tpu.dynamic_rotate %0 by %c1_i32 dim 1 : vector<8x128xf32>, i32 -> vector<8x128xf32>
    %c0_1 = arith.constant 0 : index
    %c0_2 = arith.constant 0 : index
    %2 = vector.load %arg1[%c0_1, %c0_2] : memref<8x128xf32, #tpu.memory_space<vmem>>, vector<8x128xf32>
    tpu.vector_store %arg1[%c0_1, %c0_2], %1 {strides = array<i32>} : memref<8x128xf32, #tpu.memory_space<vmem>>, vector<8x128xf32>,
    return
  }
}

</mosaic_0001>

<bundles_post_ra>
// kernel: tpu_custom_call.1
= control target key start
LH: loop header
LB: loop body
LE: loop exit
PB: predicated region body
PF: predicated region fallthrough
CT: control target
= control target key end

     0   :  { %6 = vsyncpa [#allocation3], 0  ;;  %s118_s0 = inlined_call_operand.hbm [shape: f32[8,128], index: 0, kind: input, shape index: {}]   ;;  %s119_s1 = inlined_call_operand.hbm [shape: f32[8,128], index: 1, kind: output, shape index: {}]  }
   0x1   :  { %7 = vsyncpa [#allocation4], 0  ;;  %s13_s8 = sshll.u32 %s118_s0, 4  ;;  %s99_s9 = smov [#allocation2]   ;;  %s14_s8 = int_to_ptr.hbm [resolvable:$true] %s13_s8 }
   0x2   :  { %s15_s10 = sshll.u32 %s99_s9, 4  ;;  %s16_s10 = int_to_ptr.vmem [resolvable:$true] %s15_s10 }
   0x3   :  { %18 = dma.hbm_to_vmem [thread:$0]  %s14_s8, 128, %s16_s10, [#allocation3]  }
   0x4   :  { %95 = dma.done.wait [#allocation3], 128  }
   0x5   :  { %96 = vsyncadd [#allocation3], 4294967168  ;;  %v23_v0 = vld [vmem:[#allocation2] sm:$0xff]  ;;  %s100_s11 = smov 1   ;;  %s101_s12 = smov [#allocation5]  }
   0x6   :  { %24 = vrot.lane.b32.xlu0 %v23_v0, %s100_s11  ;;  %s32_s13 = sshll.u32 %s101_s12, 4  ;;  %s34_s16 = sshll.u32 %s119_s1, 4  ;;  %s33_s13 = int_to_ptr.vmem [resolvable:$true] %s32_s13  ;;  %s35_s16 = int_to_ptr.hbm [resolvable:$true] %s34_s16 }
  0x78   :  { %v25_v1 = vpop.permute.xlu0 %24 }
  0x79   :  { %26 = vst [vmem:[#allocation5] sm:$0xff] %v25_v1 }
  0x7a   :  { %37 = dma.vmem_to_hbm [thread:$0]  %s33_s13, 128, %s35_s16, [#allocation4]  }
  0x7b   :  { %97 = dma.done.wait [#allocation4], 128  }
  0x7c   :  { %98 = vsyncadd [#allocation4], 4294967168 }
  0x7d   :  { %42 = vsyncpa [#allocation3], 1 }
  0x7e   :  { %43 = vsyncpa [#allocation4], 1 }

</bundles_post_ra>
